<compile_context>
chip_gen: v5e
topology: v5e:2x2
jax: 0.10.0
libtpu: 0.0.40
codegen_flags: <defaults>
</compile_context>

<pallas_src>
import functools

import jax
import jax.numpy as jnp
from jax.experimental import pallas as pl
from jax.experimental.pallas import tpu as pltpu

EPS = 1e-5
_LANES = 128


# ----------------------------------------------------------------------------- helpers

def _vmem_block_budget_bytes() -> int:
    """Chip-aware per-grid-step working-set budget (bytes)."""
    cap = 0
    try:
        cap = int(getattr(pltpu.get_tpu_info(), "vmem_capacity_bytes", 0))
    except Exception:
        cap = 0
    if cap <= 0:
        cap = 64 << 20  # conservative: v7x per-TC physical VMEM
    # ~1 MiB HBM-facing blocks already reach ~85% of the HBM roofline, so keep the
    # whole per-step working set far below every generation's scoped-VMEM limit
    # (v5e default scoped limit is 16 MiB) instead of chasing the largest tile.
    return min(cap // 8, 8 << 20)


def _round_up(x: int, m: int) -> int:
    return ((x + m - 1) // m) * m


def _pick_tile_rows(rows: int, row_width: int, in_itemsize: int, out_itemsize: int) -> int:
    """Largest safe row tile: bytes-capped, dtype-aware, >=2 grid steps when possible."""
    budget = _vmem_block_budget_bytes()
    # Per block row we pay: double-buffered input + double-buffered output HBM-facing
    # buffers, plus ~3 tile-sized f32 intermediates (x.astype(f32), centered, y).
    bytes_per_row = max(1, row_width * (2 * in_itemsize + 2 * out_itemsize + 3 * 4))
    tile = budget // bytes_per_row
    tile = max(8, (tile // 8) * 8)
    if rows >= 16:
        # Guarantee at least 2 grid steps so the "parallel" axis can shard across
        # both TensorCores on v7x (no-op cost on v5e/v6e: one extra ~0.35us step).
        tile = min(tile, _round_up(pl.cdiv(rows, 2), 8))
    if tile >= rows:
        return rows  # single full block (block dim == full array dim is always legal)
    return tile


# ----------------------------------------------------------------------------- kernels

def _layer_norm_rows_kernel(x_ref, gamma_ref, beta_ref, o_ref):
    """General path: one logical row per block row, stats over the lane axis."""
    x = x_ref[...].astype(jnp.float32)                        # (tile, D)
    mean = jnp.mean(x, axis=-1, keepdims=True)                # (tile, 1)
    c = x - mean
    var = jnp.mean(c * c, axis=-1, keepdims=True)             # biased variance
    y = c * jax.lax.rsqrt(var + EPS) * gamma_ref[...] + beta_ref[...]
    o_ref[...] = y.astype(o_ref.dtype)


def _layer_norm_folded_kernel(x_ref, gamma_ref, beta_ref, o_ref, *, fold, d):
    """Lane-folded path: `fold` logical rows of width d packed into one 128-lane row."""
    x = x_ref[...].astype(jnp.float32)                        # (tile, fold*d), lane-dense
    lane = jax.lax.broadcasted_iota(jnp.int32, x.shape, 1)
    mean_full = jnp.zeros_like(x)
    rstd_full = jnp.zeros_like(x)
    for s in range(fold):                                     # fold is small & static
        xs = x[:, s * d:(s + 1) * d]                          # one logical row's features
        m = jnp.mean(xs, axis=-1, keepdims=True)
        c = xs - m
        v = jnp.mean(c * c, axis=-1, keepdims=True)
        r = jax.lax.rsqrt(v + EPS)
        in_seg = (lane >= s * d) & (lane < (s + 1) * d)
        mean_full = jnp.where(in_seg, m, mean_full)
        rstd_full = jnp.where(in_seg, r, rstd_full)
    y = (x - mean_full) * rstd_full * gamma_ref[...] + beta_ref[...]
    o_ref[...] = y.astype(o_ref.dtype)


# ----------------------------------------------------------------------------- wrapper

def layer_norm_forward(x, gamma, beta):
    """x: (..., D). Returns LayerNorm(x) with the same shape and dtype as x."""
    orig_shape = x.shape
    d = int(orig_shape[-1])
    rows = 1
    for s in orig_shape[:-1]:
        rows *= int(s)

    x2 = x.reshape(rows, d)
    gamma2 = gamma.reshape(1, d).astype(jnp.float32)
    beta2 = beta.reshape(1, d).astype(jnp.float32)

    # Lane folding for narrow feature dims (keeps the HBM-facing store lane-dense).
    fold = 1
    if d < _LANES and _LANES % d == 0:
        f = _LANES // d
        if rows % f == 0:
            fold = f

    if fold > 1:
        kd = fold * d
        xk = x2.reshape(rows // fold, kd)                     # contiguous -> free reshape
        gk = jnp.tile(gamma2, (1, fold))
        bk = jnp.tile(beta2, (1, fold))
        kernel = functools.partial(_layer_norm_folded_kernel, fold=fold, d=d)
        krows, kcols = rows // fold, kd
    else:
        xk, gk, bk = x2, gamma2, beta2
        kernel = _layer_norm_rows_kernel
        krows, kcols = rows, d

    out_itemsize = jnp.dtype(x.dtype).itemsize
    tile_rows = _pick_tile_rows(krows, kcols, jnp.dtype(xk.dtype).itemsize, out_itemsize)
    n_tiles = pl.cdiv(krows, tile_rows)                       # ragged last block is masked

    y = pl.pallas_call(
        kernel,
        out_shape=jax.ShapeDtypeStruct((krows, kcols), x.dtype),
        grid_spec=pltpu.PrefetchScalarGridSpec(
            num_scalar_prefetch=0,
            grid=(n_tiles,),
            in_specs=[
                pl.BlockSpec((tile_rows, kcols), lambda i: (i, 0)),
                pl.BlockSpec((1, kcols), lambda i: (0, 0)),
                pl.BlockSpec((1, kcols), lambda i: (0, 0)),
            ],
            out_specs=pl.BlockSpec((tile_rows, kcols), lambda i: (i, 0)),
        ),
        compiler_params=pltpu.CompilerParams(
            dimension_semantics=("parallel",),
            vmem_limit_bytes=32 * 1024 * 1024,
        ),
    )(xk, gk, bk)

    return y.reshape(orig_shape)


# ----------------------------------------------------------------------------- test

def _reference(x, gamma, beta):
    xf = x.astype(jnp.float32)
    mean = jnp.mean(xf, axis=-1, keepdims=True)
    centered = xf - mean
    var = jnp.mean(centered * centered, axis=-1, keepdims=True)
    y = centered * jax.lax.rsqrt(var + EPS) * gamma + beta
    return y.astype(x.dtype)


def _check(x, gamma, beta, atol, rtol):
    out = jax.block_until_ready(layer_norm_forward(x, gamma, beta))
    ref = _reference(x, gamma, beta)
    assert out.shape == x.shape and out.dtype == x.dtype
    assert jnp.allclose(out.astype(jnp.float32), ref.astype(jnp.float32),
                        atol=atol, rtol=rtol), "mismatch vs reference"
    return out


if __name__ == "__main__":
    key = jax.random.PRNGKey(0)
    k0, k1, k2 = jax.random.split(key, 3)

    # Main case matching the module spec: batch=2, seq=8, hidden=32 (lane-folded path).
    B, S, D = 2, 8, 32
    x = jax.random.normal(k0, (B, S, D), dtype=jnp.float32) * 2.0 + 0.5
    gamma = 1.0 + 0.01 * jnp.arange(D, dtype=jnp.float32)   # nn.LayerNorm affine params
    beta = 0.1 * jnp.arange(D, dtype=jnp.float32)
    _check(x, gamma, beta, atol=1e-4, rtol=1e-4)

    # General lane-dense path with a ragged (masked) last block: 17 rows, D=128, 2 tiles.
    D2 = 128
    x2 = jax.random.normal(k1, (17, D2), dtype=jnp.float32)
    g2 = 1.0 - 0.005 * jnp.arange(D2, dtype=jnp.float32)
    b2 = 0.02 * jnp.arange(D2, dtype=jnp.float32)
    _check(x2, g2, b2, atol=1e-4, rtol=1e-4)

    # bf16 input: dtype-aware tiling + folded path (fold=2), looser tolerance.
    D3 = 64
    x3 = (jax.random.normal(k2, (4, 8, D3), dtype=jnp.float32) * 1.5).astype(jnp.bfloat16)
    g3 = jnp.ones((D3,), dtype=jnp.float32)
    b3 = jnp.zeros((D3,), dtype=jnp.float32)
    _check(x3, g3, b3, atol=3e-2, rtol=3e-2)

    print("KERNEL_OK")
</pallas_src>

<mosaic_0001>
module attributes {stable_mosaic.version = 11 : i64} {
  func.func @_layer_norm_folded_kernel(%arg0: i32, %arg1: memref<4x128xf32, #tpu.memory_space<vmem>>, %arg2: memref<1x128xf32, #tpu.memory_space<vmem>>, %arg3: memref<1x128xf32, #tpu.memory_space<vmem>>, %arg4: memref<4x128xf32, #tpu.memory_space<vmem>>) attributes {dimension_semantics = [#tpu.dimension_semantics<parallel>], iteration_bounds = array<i64: 1>, scalar_prefetch = 0 : i64, scratch_operands = 0 : i64, tpu.core_type = #tpu.core_type<tc>, window_params = [{transform_indices = @transform_0, window_bounds = array<i64: 4, 128>}, {pipeline_mode = #tpu.pipeline_mode<synchronous>, transform_indices = @transform_1, window_bounds = array<i64: 1, 128>}, {pipeline_mode = #tpu.pipeline_mode<synchronous>, transform_indices = @transform_2, window_bounds = array<i64: 1, 128>}, {transform_indices = @transform_3, window_bounds = array<i64: 4, 128>}]} {
    %c0 = arith.constant 0 : index
    %c0_0 = arith.constant 0 : index
    %0 = vector.load %arg1[%c0, %c0_0] : memref<4x128xf32, #tpu.memory_space<vmem>>, vector<4x128xf32>
    %1 = tpu.iota {dimensions = array<i32: 1>} : vector<4x128xi32>
    %cst = arith.constant 0.000000e+00 : f32
    %2 = vector.broadcast %cst : f32 to vector<4x128xf32>
    %cst_1 = arith.constant 0.000000e+00 : f32
    %3 = vector.broadcast %cst_1 : f32 to vector<4x128xf32>
    %4 = vector.extract_strided_slice %0 {offsets = [0, 0], sizes = [4, 32], strides = [1, 1]} : vector<4x128xf32> to vector<4x32xf32>
    %cst_2 = arith.constant dense<0.000000e+00> : vector<4xf32>
    %5 = vector.multi_reduction <add>, %4, %cst_2 [1] : vector<4x32xf32> to vector<4xf32>
    %6 = vector.shape_cast %5 : vector<4xf32> to vector<4x1xf32>
    %cst_3 = arith.constant 3.200000e+01 : f32
    %7 = vector.broadcast %cst_3 : f32 to vector<4x1xf32>
    %8 = arith.divf %6, %7 : vector<4x1xf32>
    %9 = vector.broadcast %8 : vector<4x1xf32> to vector<4x32xf32>
    %10 = arith.subf %4, %9 : vector<4x32xf32>
    %11 = arith.mulf %10, %10 : vector<4x32xf32>
    %cst_4 = arith.constant dense<0.000000e+00> : vector<4xf32>
    %12 = vector.multi_reduction <add>, %11, %cst_4 [1] : vector<4x32xf32> to vector<4xf32>
    %13 = vector.shape_cast %12 : vector<4xf32> to vector<4x1xf32>
    %cst_5 = arith.constant 3.200000e+01 : f32
    %14 = vector.broadcast %cst_5 : f32 to vector<4x1xf32>
    %15 = arith.divf %13, %14 : vector<4x1xf32>
    %cst_6 = arith.constant 9.99999974E-6 : f32
    %16 = vector.broadcast %cst_6 : f32 to vector<4x1xf32>
    %17 = arith.addf %15, %16 : vector<4x1xf32>
    %18 = math.rsqrt %17 : vector<4x1xf32>
    %c0_i32 = arith.constant 0 : i32
    %19 = vector.broadcast %c0_i32 : i32 to vector<4x128xi32>
    %20 = arith.cmpi sge, %1, %19 : vector<4x128xi32>
    %c32_i32 = arith.constant 32 : i32
    %21 = vector.broadcast %c32_i32 : i32 to vector<4x128xi32>
    %22 = arith.cmpi slt, %1, %21 : vector<4x128xi32>
    %23 = arith.andi %20, %22 : vector<4x128xi1>
    %24 = vector.shape_cast %8 : vector<4x1xf32> to vector<4x1xf32>
    %25 = vector.broadcast %24 : vector<4x1xf32> to vector<4x128xf32>
    %26 = arith.select %23, %25, %2 : vector<4x128xi1>, vector<4x128xf32>
    %27 = vector.shape_cast %18 : vector<4x1xf32> to vector<4x1xf32>
    %28 = vector.broadcast %27 : vector<4x1xf32> to vector<4x128xf32>
    %29 = arith.select %23, %28, %3 : vector<4x128xi1>, vector<4x128xf32>
    %30 = vector.extract_strided_slice %0 {offsets = [0, 32], sizes = [4, 32], strides = [1, 1]} : vector<4x128xf32> to vector<4x32xf32>
    %cst_7 = arith.constant dense<0.000000e+00> : vector<4xf32>
    %31 = vector.multi_reduction <add>, %30, %cst_7 [1] : vector<4x32xf32> to vector<4xf32>
    %32 = vector.shape_cast %31 : vector<4xf32> to vector<4x1xf32>
    %cst_8 = arith.constant 3.200000e+01 : f32
    %33 = vector.broadcast %cst_8 : f32 to vector<4x1xf32>
    %34 = arith.divf %32, %33 : vector<4x1xf32>
    %35 = vector.broadcast %34 : vector<4x1xf32> to vector<4x32xf32>
    %36 = arith.subf %30, %35 : vector<4x32xf32>
    %37 = arith.mulf %36, %36 : vector<4x32xf32>
    %cst_9 = arith.constant dense<0.000000e+00> : vector<4xf32>
    %38 = vector.multi_reduction <add>, %37, %cst_9 [1] : vector<4x32xf32> to vector<4xf32>
    %39 = vector.shape_cast %38 : vector<4xf32> to vector<4x1xf32>
    %cst_10 = arith.constant 3.200000e+01 : f32
    %40 = vector.broadcast %cst_10 : f32 to vector<4x1xf32>
    %41 = arith.divf %39, %40 : vector<4x1xf32>
    %cst_11 = arith.constant 9.99999974E-6 : f32
    %42 = vector.broadcast %cst_11 : f32 to vector<4x1xf32>
    %43 = arith.addf %41, %42 : vector<4x1xf32>
    %44 = math.rsqrt %43 : vector<4x1xf32>
    %c32_i32_12 = arith.constant 32 : i32
    %45 = vector.broadcast %c32_i32_12 : i32 to vector<4x128xi32>
    %46 = arith.cmpi sge, %1, %45 : vector<4x128xi32>
    %c64_i32 = arith.constant 64 : i32
    %47 = vector.broadcast %c64_i32 : i32 to vector<4x128xi32>
    %48 = arith.cmpi slt, %1, %47 : vector<4x128xi32>
    %49 = arith.andi %46, %48 : vector<4x128xi1>
    %50 = vector.shape_cast %34 : vector<4x1xf32> to vector<4x1xf32>
    %51 = vector.broadcast %50 : vector<4x1xf32> to vector<4x128xf32>
    %52 = arith.select %49, %51, %26 : vector<4x128xi1>, vector<4x128xf32>
    %53 = vector.shape_cast %44 : vector<4x1xf32> to vector<4x1xf32>
    %54 = vector.broadcast %53 : vector<4x1xf32> to vector<4x128xf32>
    %55 = arith.select %49, %54, %29 : vector<4x128xi1>, vector<4x128xf32>
    %56 = vector.extract_strided_slice %0 {offsets = [0, 64], sizes = [4, 32], strides = [1, 1]} : vector<4x128xf32> to vector<4x32xf32>
    %cst_13 = arith.constant dense<0.000000e+00> : vector<4xf32>
    %57 = vector.multi_reduction <add>, %56, %cst_13 [1] : vector<4x32xf32> to vector<4xf32>
    %58 = vector.shape_cast %57 : vector<4xf32> to vector<4x1xf32>
    %cst_14 = arith.constant 3.200000e+01 : f32
    %59 = vector.broadcast %cst_14 : f32 to vector<4x1xf32>
    %60 = arith.divf %58, %59 : vector<4x1xf32>
    %61 = vector.broadcast %60 : vector<4x1xf32> to vector<4x32xf32>
    %62 = arith.subf %56, %61 : vector<4x32xf32>
    %63 = arith.mulf %62, %62 : vector<4x32xf32>
    %cst_15 = arith.constant dense<0.000000e+00> : vector<4xf32>
    %64 = vector.multi_reduction <add>, %63, %cst_15 [1] : vector<4x32xf32> to vector<4xf32>
    %65 = vector.shape_cast %64 : vector<4xf32> to vector<4x1xf32>
    %cst_16 = arith.constant 3.200000e+01 : f32
    %66 = vector.broadcast %cst_16 : f32 to vector<4x1xf32>
    %67 = arith.divf %65, %66 : vector<4x1xf32>
    %cst_17 = arith.constant 9.99999974E-6 : f32
    %68 = vector.broadcast %cst_17 : f32 to vector<4x1xf32>
    %69 = arith.addf %67, %68 : vector<4x1xf32>
    %70 = math.rsqrt %69 : vector<4x1xf32>
    %c64_i32_18 = arith.constant 64 : i32
    %71 = vector.broadcast %c64_i32_18 : i32 to vector<4x128xi32>
    %72 = arith.cmpi sge, %1, %71 : vector<4x128xi32>
    %c96_i32 = arith.constant 96 : i32
    %73 = vector.broadcast %c96_i32 : i32 to vector<4x128xi32>
    %74 = arith.cmpi slt, %1, %73 : vector<4x128xi32>
    %75 = arith.andi %72, %74 : vector<4x128xi1>
    %76 = vector.shape_cast %60 : vector<4x1xf32> to vector<4x1xf32>
    %77 = vector.broadcast %76 : vector<4x1xf32> to vector<4x128xf32>
    %78 = arith.select %75, %77, %52 : vector<4x128xi1>, vector<4x128xf32>
    %79 = vector.shape_cast %70 : vector<4x1xf32> to vector<4x1xf32>
    %80 = vector.broadcast %79 : vector<4x1xf32> to vector<4x128xf32>
    %81 = arith.select %75, %80, %55 : vector<4x128xi1>, vector<4x128xf32>
    %82 = vector.extract_strided_slice %0 {offsets = [0, 96], sizes = [4, 32], strides = [1, 1]} : vector<4x128xf32> to vector<4x32xf32>
    %cst_19 = arith.constant dense<0.000000e+00> : vector<4xf32>
    %83 = vector.multi_reduction <add>, %82, %cst_19 [1] : vector<4x32xf32> to vector<4xf32>
    %84 = vector.shape_cast %83 : vector<4xf32> to vector<4x1xf32>
    %cst_20 = arith.constant 3.200000e+01 : f32
    %85 = vector.broadcast %cst_20 : f32 to vector<4x1xf32>
    %86 = arith.divf %84, %85 : vector<4x1xf32>
    %87 = vector.broadcast %86 : vector<4x1xf32> to vector<4x32xf32>
    %88 = arith.subf %82, %87 : vector<4x32xf32>
    %89 = arith.mulf %88, %88 : vector<4x32xf32>
    %cst_21 = arith.constant dense<0.000000e+00> : vector<4xf32>
    %90 = vector.multi_reduction <add>, %89, %cst_21 [1] : vector<4x32xf32> to vector<4xf32>
    %91 = vector.shape_cast %90 : vector<4xf32> to vector<4x1xf32>
    %cst_22 = arith.constant 3.200000e+01 : f32
    %92 = vector.broadcast %cst_22 : f32 to vector<4x1xf32>
    %93 = arith.divf %91, %92 : vector<4x1xf32>
    %cst_23 = arith.constant 9.99999974E-6 : f32
    %94 = vector.broadcast %cst_23 : f32 to vector<4x1xf32>
    %95 = arith.addf %93, %94 : vector<4x1xf32>
    %96 = math.rsqrt %95 : vector<4x1xf32>
    %c96_i32_24 = arith.constant 96 : i32
    %97 = vector.broadcast %c96_i32_24 : i32 to vector<4x128xi32>
    %98 = arith.cmpi sge, %1, %97 : vector<4x128xi32>
    %c128_i32 = arith.constant 128 : i32
    %99 = vector.broadcast %c128_i32 : i32 to vector<4x128xi32>
    %100 = arith.cmpi slt, %1, %99 : vector<4x128xi32>
    %101 = arith.andi %98, %100 : vector<4x128xi1>
    %102 = vector.shape_cast %86 : vector<4x1xf32> to vector<4x1xf32>
    %103 = vector.broadcast %102 : vector<4x1xf32> to vector<4x128xf32>
    %104 = arith.select %101, %103, %78 : vector<4x128xi1>, vector<4x128xf32>
    %105 = vector.shape_cast %96 : vector<4x1xf32> to vector<4x1xf32>
    %106 = vector.broadcast %105 : vector<4x1xf32> to vector<4x128xf32>
    %107 = arith.select %101, %106, %81 : vector<4x128xi1>, vector<4x128xf32>
    %108 = arith.subf %0, %104 : vector<4x128xf32>
    %109 = arith.mulf %108, %107 : vector<4x128xf32>
    %c0_25 = arith.constant 0 : index
    %c0_26 = arith.constant 0 : index
    %110 = vector.load %arg2[%c0_25, %c0_26] : memref<1x128xf32, #tpu.memory_space<vmem>>, vector<1x128xf32>
    %111 = vector.broadcast %110 : vector<1x128xf32> to vector<4x128xf32>
    %112 = arith.mulf %109, %111 : vector<4x128xf32>
    %c0_27 = arith.constant 0 : index
    %c0_28 = arith.constant 0 : index
    %113 = vector.load %arg3[%c0_27, %c0_28] : memref<1x128xf32, #tpu.memory_space<vmem>>, vector<1x128xf32>
    %114 = vector.broadcast %113 : vector<1x128xf32> to vector<4x128xf32>
    %115 = arith.addf %112, %114 : vector<4x128xf32>
    %c0_29 = arith.constant 0 : index
    %c0_30 = arith.constant 0 : index
    %116 = vector.load %arg4[%c0_29, %c0_30] : memref<4x128xf32, #tpu.memory_space<vmem>>, vector<4x128xf32>
    tpu.vector_store %arg4[%c0_29, %c0_30], %115 {strides = array<i32>} : memref<4x128xf32, #tpu.memory_space<vmem>>, vector<4x128xf32>,
    return
  }
  func.func @transform_0(%arg0: i32) -> (i32, i32) {
    %c0_i32 = arith.constant 0 : i32
    %c0_i32_0 = arith.constant 0 : i32
    return %arg0, %c0_i32 : i32, i32
  }
  func.func @transform_1(%arg0: i32) -> (i32, i32) {
    %c0_i32 = arith.constant 0 : i32
    %c0_i32_0 = arith.constant 0 : i32
    %c0_i32_1 = arith.constant 0 : i32
    return %c0_i32, %c0_i32_0 : i32, i32
  }
  func.func @transform_2(%arg0: i32) -> (i32, i32) {
    %c0_i32 = arith.constant 0 : i32
    %c0_i32_0 = arith.constant 0 : i32
    %c0_i32_1 = arith.constant 0 : i32
    return %c0_i32, %c0_i32_0 : i32, i32
  }
  func.func @transform_3(%arg0: i32) -> (i32, i32) {
    %c0_i32 = arith.constant 0 : i32
    %c0_i32_0 = arith.constant 0 : i32
    return %arg0, %c0_i32 : i32, i32
  }
}

</mosaic_0001>

<bundles_post_ra>
// kernel: tpu_custom_call.1
= control target key start
LH: loop header
LB: loop body
LE: loop exit
PB: predicated region body
PF: predicated region fallthrough
CT: control target
= control target key end

     0   :  { %8 = vsyncpa [#allocation3], 0  ;;  %s423_s0 = inlined_call_operand.hbm [shape: f32[4,128], index: 0, kind: input, shape index: {}]   ;;  %s424_s1 = inlined_call_operand.hbm [shape: f32[1,128], index: 1, kind: input, shape index: {}]   ;;  %s425_s2 = inlined_call_operand.vmem [shape: f32[1,128], index: 2, kind: input, shape index: {}]   ;;  %s426_s3 = inlined_call_operand.hbm [shape: f32[4,128], index: 3, kind: output, shape index: {}]  }
   0x1   :  { %9 = vsyncpa [#allocation6], 0 }
   0x2   :  { %10 = vsyncpa [#allocation4], 0  ;;  %s16_s14 = sshll.u32 %s423_s0, 4  ;;  %s308_s15 = smov [#allocation2]   ;;  %s17_s14 = int_to_ptr.hbm [resolvable:$true] %s16_s14 }
   0x3   :  { %s18_s16 = sshll.u32 %s308_s15, 4  ;;  %s27_s19 = sshll.u32 %s424_s1, 4  ;;  %s19_s16 = int_to_ptr.vmem [resolvable:$true] %s18_s16  ;;  %s28_s19 = int_to_ptr.hbm [resolvable:$true] %s27_s19 }
   0x4   :  { %21 = dma.hbm_to_vmem [thread:$0]  %s17_s14, 64, %s19_s16, [#allocation3]  }
   0x5   :  { %s309_s20 = smov [#allocation5]  }
   0x6   :  { %s29_s21 = sshll.u32 %s309_s20, 4  ;;  %s30_s21 = int_to_ptr.vmem [resolvable:$true] %s29_s21 }
   0x7   :  { %32 = dma.hbm_to_vmem [thread:$0]  %s28_s19, 16, %s30_s21, [#allocation6]  }
   0x8   :  { %302 = dma.done.wait [#allocation3], 64  }
   0x9   :  { %303 = vsyncadd [#allocation3], 4294967232 }
   0xa   :  { %304 = dma.done.wait [#allocation6], 16  }
   0xb   :  { %305 = vsyncadd [#allocation6], 4294967280  ;;  %v341_v0 = vld [vmem:[#allocation2] sm:$0xf]  ;;  %s310_s0 = smov 96   ;;  %s311_s22 = smov 32   ;;  %v44_v18 = vlaneseq }
   0xc   :  { %81 = vrot.lane.b32.xlu0 %v341_v0, %s310_s0  ;;  %147 = vrot.lane.b32.xlu1 %v341_v0, %s311_s22  ;;  %s312_s1 = smov 64   ;;  %vm46_vm0 = vcmask 257024   ;;  %v313_v8 = vmov 32.0   ;;  %s314_s25 = smov [#allocation7]  }
   0xd   :  { %v47_v1 = vsel %vm46_vm0, %v341_v0, 0.0  ;;  %220 = vrcp.f32 %v313_v8  ;;  %v358_v20 = vand.u32 127, %v44_v18  ;;  %s198_s26 = sshll.u32 %s314_s25, 4  ;;  %s200_s29 = sshll.u32 %s426_s3, 4  ;;  %s199_s26 = int_to_ptr.vmem [resolvable:$true] %s198_s26  ;;  %s201_s29 = int_to_ptr.hbm [resolvable:$true] %s200_s29 }
   0xf   :  { %vm76_vm2 = vcmp.lt.s32.totalorder %v358_v20, 32  ;;  %vm109_vm3 = vcmp.ge.s32.totalorder %v358_v20, 32  ;;  %vm110_vm4 = vcmp.lt.s32.totalorder %v358_v20, 64  ;;  %vm142_vm6 = vcmp.ge.s32.totalorder %v358_v20, 64 }
  0x10   :  { %vm366_vm5 = vmand %vm109_vm3, %vm110_vm4  ;;  %vm143_vm7 = vcmp.lt.s32.totalorder %v358_v20, 96  ;;  %vm175_vm9 = vcmp.ge.s32.totalorder %v358_v20, 96 }
  0x11   :  { %vm377_vm8 = vmand %vm142_vm6, %vm143_vm7 }
  0x13   :  { %v221_v9 = vpop.eup %220 }
  0x14   :  { %114 = vrot.lane.b32.xlu0 %v341_v0, %s312_s1  ;;  %v51_v10 = vmul.f32 32.0, %v221_v9  ;;  %vm55_vm1 = vweird.f32 %v221_v9 }
  0x16   :  { %v52_v11 = vsub.f32 1.0, %v51_v10 }
  0x18   :  { %v53_v12 = vmul.f32 %v221_v9, %v52_v11 }
  0x1a   :  { %v54_v13 = vadd.f32 %v221_v9, %v53_v12 }
  0x1c   :  { %v354_v14 = vsel %vm55_vm1, %v221_v9, %v54_v13 }
  0x3e   :  { %48 = vadd.xlane.f32.xlu0 %v47_v1 }
  0x7e   :  { %v82_v2 = vpop.permute.xlu0 %81  ;;  %v148_v6 = vpop.permute.xlu1 %147 }
  0x7f   :  { %v84_v3 = vsel %vm46_vm0, %v82_v2, 0.0  ;;  %v150_v7 = vsel %vm46_vm0, %v148_v6, 0.0 }
  0x80   :  { %85 = vadd.xlane.f32.xlu1 %v84_v3 }
  0x86   :  { %v115_v4 = vpop.permute.xlu0 %114 }
  0x87   :  { %v117_v5 = vsel %vm46_vm0, %v115_v4, 0.0 }
  0x88   :  { %118 = vadd.xlane.f32.xlu2 %v117_v5 }
  0x90   :  { %151 = vadd.xlane.f32.xlu2 %v150_v7 }
  0xb1   :  { %v49_v15 = vpop.xlane.xlu0 %48 }
  0xb2   :  { %v57_v16 = vmul.f32 %v354_v14, %v49_v15 }
  0xb4   :  { %v58_v17 = vsub.f32 %v341_v0, %v57_v16  ;;  %v78_v22 = vsel %vm76_vm2, %v57_v16, 0.0 }
  0xb6   :  { %v59_v19 = vmul.f32 %v58_v17, %v58_v17 }
  0xb8   :  { %v60_v21 = vsel %vm46_vm0, %v59_v19, 0.0 }
  0xb9   :  { %61 = vadd.xlane.f32.xlu1 %v60_v21 }
  0xf3   :  { %v86_v24 = vpop.xlane.xlu1 %85 }
  0xf4   :  { %v87_v25 = vmul.f32 %v86_v24, %v354_v14 }
  0xf6   :  { %v88_v26 = vsub.f32 %v341_v0, %v87_v25  ;;  %v112_v27 = vsel %vm366_vm5, %v87_v25, %v78_v22 }
  0xf8   :  { %v89_v28 = vmul.f32 %v88_v26, %v88_v26 }
  0xfa   :  { %91 = vrot.lane.b32.xlu2 %v89_v28, %s310_s0 }
  0xfb   :  { %v119_v30 = vpop.xlane.xlu2 %118 }
  0xfc   :  { %v120_v31 = vmul.f32 %v119_v30, %v354_v14 }
  0xfe   :  { %v121_v32 = vsub.f32 %v341_v0, %v120_v31  ;;  %v145_v33 = vsel %vm377_vm8, %v120_v31, %v112_v27  ;;  %v218_v31 = vld [vmem:[#allocation5] ss:$0 sm:$0xff] }
 0x100   :  { %v122_v34 = vmul.f32 %v121_v32, %v121_v32 }
 0x102   :  { %124 = vrot.lane.b32.xlu2 %v122_v34, %s312_s1  ;;  %v219_v34 = vld [vmem:[%s425_s2] ss:$0 sm:$0xff] }
 0x103   :  { %v152_v35 = vpop.xlane.xlu2 %151 }
 0x104   :  { %v153_v36 = vmul.f32 %v152_v35, %v354_v14 }
 0x106   :  { %v154_v37 = vsub.f32 %v341_v0, %v153_v36  ;;  %v391_v38 = vsel %vm175_vm9, %v153_v36, %v145_v33 }
 0x107   :  { %v180_v27 = vsub.f32 %v341_v0, %v391_v38 }
 0x108   :  { %v155_v39 = vmul.f32 %v154_v37, %v154_v37 }
 0x10a   :  { %157 = vrot.lane.b32.xlu2 %v155_v39, %s311_s22 }
 0x12c   :  { %v62_v46 = vpop.xlane.xlu1 %61 }
 0x12d   :  { %v63_v47 = vmul.f32 %v62_v46, %v354_v14 }
 0x12f   :  { %v64_v48 = vadd.f32 1e-05, %v63_v47 }
 0x131   :  { %222 = vrsqrt.f32 %v64_v48  ;;  %vm71_vm10 = vweird.f32 %v64_v48 }
 0x137   :  { %v223_v54 = vpop.eup %222 }
 0x138   :  { %v66_v57 = vmul.f32 %v223_v54, %v64_v48  ;;  %vm72_vm11 = vweird.f32 %v223_v54 }
 0x139   :  { %vm401_vm12 = vmor %vm71_vm10, %vm72_vm11 }
 0x13a   :  { %v67_v60 = vmul.f32 %v223_v54, %v66_v57 }
 0x13c   :  { %v68_v3 = vmul.f32 0.5, %v67_v60 }
 0x13e   :  { %v69_v7 = vsub.f32 1.5, %v68_v3 }
 0x140   :  { %v70_v12 = vmul.f32 %v223_v54, %v69_v7 }
 0x142   :  { %v74_v18 = vsel %vm401_vm12, %v223_v54, %v70_v12 }
 0x143   :  { %v79_v24 = vsel %vm76_vm2, %v74_v18, 0.0 }
 0x154   :  { %v92_v40 = vpop.permute.xlu2 %91 }
 0x155   :  { %v94_v41 = vsel %vm46_vm0, %v92_v40, 0.0 }
 0x156   :  { %95 = vadd.xlane.f32.xlu2 %v94_v41 }
 0x15c   :  { %v125_v42 = vpop.permute.xlu2 %124 }
 0x15d   :  { %v127_v43 = vsel %vm46_vm0, %v125_v42, 0.0 }
 0x15e   :  { %128 = vadd.xlane.f32.xlu0 %v127_v43 }
 0x164   :  { %v158_v44 = vpop.permute.xlu2 %157 }
 0x165   :  { %v160_v45 = vsel %vm46_vm0, %v158_v44, 0.0 }
 0x166   :  { %161 = vadd.xlane.f32.xlu1 %v160_v45 }
 0x1c9   :  { %v96_v49 = vpop.xlane.xlu2 %95 }
 0x1ca   :  { %v97_v50 = vmul.f32 %v96_v49, %v354_v14 }
 0x1cc   :  { %v98_v51 = vadd.f32 1e-05, %v97_v50 }
 0x1ce   :  { %224 = vrsqrt.f32 %v98_v51  ;;  %vm105_vm15 = vweird.f32 %v98_v51 }
 0x1d1   :  { %v129_v52 = vpop.xlane.xlu0 %128 }
 0x1d2   :  { %v130_v53 = vmul.f32 %v129_v52, %v354_v14 }
 0x1d4   :  { %v225_v55 = vpop.eup %224  ;;  %v131_v56 = vadd.f32 1e-05, %v130_v53 }
 0x1d5   :  { %v100_v58 = vmul.f32 %v225_v55, %v98_v51  ;;  %vm106_vm13 = vweird.f32 %v225_v55 }
 0x1d6   :  { %226 = vrsqrt.f32 %v131_v56  ;;  %vm107_vm0 = vmor %vm105_vm15, %vm106_vm13  ;;  %vm138_vm1 = vweird.f32 %v131_v56 }
 0x1d7   :  { %v101_v62 = vmul.f32 %v225_v55, %v100_v58 }
 0x1d9   :  { %v162_v59 = vpop.xlane.xlu1 %161  ;;  %v102_v4 = vmul.f32 0.5, %v101_v62 }
 0x1da   :  { %v163_v61 = vmul.f32 %v162_v59, %v354_v14 }
 0x1db   :  { %v103_v8 = vsub.f32 1.5, %v102_v4 }
 0x1dc   :  { %v227_v63 = vpop.eup %226  ;;  %v164_v1 = vadd.f32 1e-05, %v163_v61 }
 0x1dd   :  { %v133_v2 = vmul.f32 %v227_v63, %v131_v56  ;;  %v104_v14 = vmul.f32 %v225_v55, %v103_v8  ;;  %vm139_vm14 = vweird.f32 %v227_v63 }
 0x1de   :  { %228 = vrsqrt.f32 %v164_v1  ;;  %vm140_vm3 = vmor %vm138_vm1, %vm139_vm14  ;;  %vm171_vm6 = vweird.f32 %v164_v1 }
 0x1df   :  { %v134_v5 = vmul.f32 %v227_v63, %v133_v2  ;;  %v108_v19 = vsel %vm107_vm0, %v225_v55, %v104_v14 }
 0x1e0   :  { %v113_v26 = vsel %vm366_vm5, %v108_v19, %v79_v24 }
 0x1e1   :  { %v135_v6 = vmul.f32 0.5, %v134_v5 }
 0x1e3   :  { %v136_v10 = vsub.f32 1.5, %v135_v6 }
 0x1e4   :  { %v229_v9 = vpop.eup %228 }
 0x1e5   :  { %v166_v11 = vmul.f32 %v229_v9, %v164_v1  ;;  %v137_v16 = vmul.f32 %v227_v63, %v136_v10  ;;  %vm172_vm4 = vweird.f32 %v229_v9 }
 0x1e6   :  { %vm173_vm7 = vmor %vm171_vm6, %vm172_vm4 }
 0x1e7   :  { %v167_v15 = vmul.f32 %v229_v9, %v166_v11  ;;  %v141_v22 = vsel %vm140_vm3, %v227_v63, %v137_v16 }
 0x1e8   :  { %v146_v28 = vsel %vm377_vm8, %v141_v22, %v113_v26 }
 0x1e9   :  { %v168_v17 = vmul.f32 0.5, %v167_v15 }
 0x1eb   :  { %v169_v21 = vsub.f32 1.5, %v168_v17 }
 0x1ed   :  { %v170_v25 = vmul.f32 %v229_v9, %v169_v21 }
 0x1ef   :  { %v174_v30 = vsel %vm173_vm7, %v229_v9, %v170_v25 }
 0x1f0   :  { %v179_v32 = vsel %vm175_vm9, %v174_v30, %v146_v28 }
 0x1f1   :  { %v181_v33 = vmul.f32 %v180_v27, %v179_v32 }
 0x1f3   :  { %v186_v0 = vmul.f32 %v218_v31, %v181_v33 }
 0x1f5   :  { %v191_v23 = vadd.f32 %v219_v34, %v186_v0 }
 0x1f7   :  { %192 = vst [vmem:[#allocation7] sm:$0xf] %v191_v23 }
 0x1f8   :  { %203 = dma.vmem_to_hbm [thread:$0]  %s199_s26, 64, %s201_s29, [#allocation4]  }
 0x1f9   :  { %306 = dma.done.wait [#allocation4], 64  }
 0x1fa   :  { %307 = vsyncadd [#allocation4], 4294967232 }
 0x1fb   :  { %208 = vsyncpa [#allocation3], 1 }
 0x1fc   :  { %209 = vsyncpa [#allocation6], 1 }
 0x1fd   :  { %210 = vsyncpa [#allocation4], 1 }

</bundles_post_ra>
